<compile_context>
chip_gen: v6e
topology: v6e:2x2x1
jax: 0.10.0
libtpu: 0.0.40
codegen_flags: <defaults>
</compile_context>

<pallas_src>
import jax
import jax.numpy as jnp
from jax.experimental import pallas as pl
from jax.experimental.pallas import tpu as pltpu


LEAKY_SLOPE = 0.01   # torch.nn.LeakyReLU default negative_slope
SUBLANE = 8          # f32 sublane width: batch tiles must be multiples of this
SPLIT_ROWS = 256     # only force a >=2-step grid (v7x megacore) above this many rows


def _round_up(x, m):
    return (x + m - 1) // m * m


def _cdiv(a, b):
    return (a + b - 1) // b


def _make_mlp_kernel(n_layers: int, mxu_dtype):
    """Kernel computing the full MLP for one batch tile (all layers fused)."""

    def kernel(*refs):
        # refs = (x_ref, w1_ref, b1_ref, ..., wn_ref, bn_ref, out_ref)
        x_ref = refs[0]
        out_ref = refs[-1]
        h = x_ref[...]                          # already in mxu_dtype
        for layer in range(n_layers):
            w_ref = refs[1 + 2 * layer]
            b_ref = refs[2 + 2 * layer]
            acc = jnp.dot(h, w_ref[...], preferred_element_type=jnp.float32)
            acc = acc + b_ref[...]              # biases kept f32
            # LeakyReLU (final_layer_act=True -> applied after every layer).
            acc = jnp.maximum(acc, LEAKY_SLOPE * acc)
            # Cast back to the MXU dtype only when another matmul follows.
            h = acc if layer == n_layers - 1 else acc.astype(mxu_dtype)
        out_ref[...] = h.astype(out_ref.dtype)

    return kernel


def make_fcn_policy(weights, biases, grp_size, *,
                    weight_dtype=jnp.bfloat16, batch_tile=512):
    """Build a jitted Pallas forward for FCNPolicy.

    Args:
      weights: list of (in_f, out_f) arrays (i.e. pytorch weight.T).
      biases:  list of (out_f,) or (1, out_f) arrays.
      grp_size: group size; out_size must be divisible by it.
      weight_dtype: dtype fed to the MXU (bf16 is native on v5e/v6e/v7x;
        accumulation is always f32).
      batch_tile: requested rows per grid step (rounded to a multiple of 8).

    Returns:
      forward(x: (B, in_size) f32) -> (B, grp_size, bins) f32.
    """
    n_layers = len(weights)
    sizes = [int(weights[0].shape[0])] + [int(w.shape[1]) for w in weights]
    in_size, out_size = sizes[0], sizes[-1]
    assert out_size % grp_size == 0
    bins = out_size // grp_size

    # Cast / reshape parameters ONCE (not per forward call).
    flat_params = []
    for w, b in zip(weights, biases):
        flat_params.append(jnp.asarray(w, weight_dtype))
        flat_params.append(jnp.asarray(b, jnp.float32).reshape(1, -1))
    param_bytes = sum(int(a.size) * a.dtype.itemsize for a in flat_params)

    kernel = _make_mlp_kernel(n_layers, weight_dtype)
    x_itemsize = jnp.dtype(weight_dtype).itemsize

    @jax.jit
    def forward(x):
        B, xin = x.shape
        assert xin == in_size

        # --- batch tiling -------------------------------------------------
        tile = _round_up(max(min(batch_tile, B), SUBLANE), SUBLANE)
        rounded_b = _round_up(B, SUBLANE)
        tile = min(tile, rounded_b)
        if rounded_b >= SPLIT_ROWS:
            # Keep >= 2 grid steps so v7x's two TensorCores both get work.
            tile = min(tile, _round_up(_cdiv(rounded_b, 2), SUBLANE))
        n_rows = _round_up(B, tile)

        x_p = x.astype(weight_dtype)            # feed the MXU dtype directly
        if n_rows != B:
            x_p = jnp.pad(x_p, ((0, n_rows - B), (0, 0)))

        # --- block specs (no feature padding; full-array weight blocks) ----
        in_specs = [pl.BlockSpec((tile, in_size), lambda i: (i, 0))]
        for layer in range(n_layers):
            wi, wo = sizes[layer], sizes[layer + 1]
            in_specs.append(pl.BlockSpec((wi, wo), lambda i: (0, 0)))
            in_specs.append(pl.BlockSpec((1, wo), lambda i: (0, 0)))
        out_specs = pl.BlockSpec((tile, out_size), lambda i: (i, 0))

        flops = 2 * n_rows * sum(sizes[l] * sizes[l + 1] for l in range(n_layers))
        bytes_accessed = (n_rows * in_size * x_itemsize
                          + n_rows * out_size * 4 + param_bytes)
        cost = pl.CostEstimate(flops=int(flops), transcendentals=0,
                               bytes_accessed=int(bytes_accessed))

        # Resident footprint: double-buffered x/out blocks + all weights/biases
        # (conservatively counted double-buffered as well).
        footprint = (2 * tile * in_size * x_itemsize
                     + 2 * tile * out_size * 4
                     + 2 * param_bytes)
        vmem_limit = int(min(64 << 20, max(32 << 20, footprint + (4 << 20))))
        # TODO(synk): if the resident weights alone approach ~48 MiB (v7x has
        # only 64 MiB VMEM), switch to hidden-dim-tiled weight blocks with an
        # f32 accumulator grid axis instead of whole-array weight blocks.

        out = pl.pallas_call(
            kernel,
            out_shape=jax.ShapeDtypeStruct((n_rows, out_size), jnp.float32),
            grid_spec=pltpu.PrefetchScalarGridSpec(
                num_scalar_prefetch=0,
                grid=(n_rows // tile,),
                in_specs=in_specs,
                out_specs=out_specs,
            ),
            compiler_params=pltpu.CompilerParams(
                dimension_semantics=("parallel",),
                vmem_limit_bytes=vmem_limit),
            cost_estimate=cost,
        )(x_p, *flat_params)

        # .view((-1, grp_size, bins)) in the PyTorch module (unpadded rows only).
        return out[:B].reshape(-1, grp_size, bins)

    return forward


# ----------------------------- test harness ---------------------------------

def _init_params(key, sizes):
    """Deterministic PyTorch-style (uniform +-1/sqrt(fan_in)) initialization."""
    weights, biases = [], []
    for j in range(len(sizes) - 1):
        fan_in, fan_out = sizes[j], sizes[j + 1]
        key, kw, kb = jax.random.split(key, 3)
        bound = 1.0 / jnp.sqrt(fan_in)
        # Stored already transposed: (in_features, out_features).
        w = jax.random.uniform(kw, (fan_in, fan_out), jnp.float32, -bound, bound)
        b = jax.random.uniform(kb, (1, fan_out), jnp.float32, -bound, bound)
        weights.append(w)
        biases.append(b)
    return weights, biases


def _reference_forward(x, weights, biases, grp_size):
    h = x
    for w, b in zip(weights, biases):
        h = h @ w + b.reshape(1, -1)
        h = jnp.where(h >= 0, h, LEAKY_SLOPE * h)
    out_size = weights[-1].shape[1]
    return h.reshape(-1, grp_size, out_size // grp_size)


if __name__ == "__main__":
    # Shapes consistent with FCNPolicy(in_size, n_hids, out_size, grp_size).
    in_size = 32
    n_hids = [64, 64]
    out_size = 32
    grp_size = 4            # bins = 8
    batch = 256             # -> 2 grid steps of 128 rows (megacore-friendly)

    sizes = [in_size] + n_hids + [out_size]

    key = jax.random.PRNGKey(0)
    key, kx = jax.random.split(key)
    x = jax.random.normal(kx, (batch, in_size), jnp.float32)
    weights, biases = _init_params(key, sizes)

    ref = _reference_forward(x, weights, biases, grp_size)

    # f32-weight path (tolerance covers XLA-vs-MXU matmul precision modes).
    fwd_f32 = make_fcn_policy(weights, biases, grp_size,
                              weight_dtype=jnp.float32)
    out = jax.block_until_ready(fwd_f32(x))
    assert out.shape == (batch, grp_size, out_size // grp_size)
    assert jnp.allclose(out, ref, atol=2e-2, rtol=2e-2)

    # Ragged batch (exercises the batch-row zero-padding path).
    x_small = x[:19]
    out_small = jax.block_until_ready(fwd_f32(x_small))
    ref_small = _reference_forward(x_small, weights, biases, grp_size)
    assert out_small.shape == (19, grp_size, out_size // grp_size)
    assert jnp.allclose(out_small, ref_small, atol=2e-2, rtol=2e-2)

    # Default bf16-weight path (MXU-native on v5e/v6e/v7x), loose tolerance.
    fwd_bf16 = make_fcn_policy(weights, biases, grp_size)
    out_bf16 = jax.block_until_ready(fwd_bf16(x))
    assert out_bf16.shape == (batch, grp_size, out_size // grp_size)
    assert jnp.allclose(out_bf16, ref, atol=1e-1, rtol=5e-2)

    print("KERNEL_OK")
</pallas_src>

<mosaic_0001>
module attributes {stable_mosaic.version = 11 : i64} {
  func.func @kernel(%arg0: i32, %arg1: memref<128x32xf32, #tpu.memory_space<vmem>>, %arg2: memref<32x64xf32, #tpu.memory_space<vmem>>, %arg3: memref<1x64xf32, #tpu.memory_space<vmem>>, %arg4: memref<64x64xf32, #tpu.memory_space<vmem>>, %arg5: memref<1x64xf32, #tpu.memory_space<vmem>>, %arg6: memref<64x32xf32, #tpu.memory_space<vmem>>, %arg7: memref<1x32xf32, #tpu.memory_space<vmem>>, %arg8: memref<128x32xf32, #tpu.memory_space<vmem>>) attributes {dimension_semantics = [#tpu.dimension_semantics<parallel>], iteration_bounds = array<i64: 2>, scalar_prefetch = 0 : i64, scratch_operands = 0 : i64, tpu.core_type = #tpu.core_type<tc>, window_params = [{transform_indices = @transform_0, window_bounds = array<i64: 128, 32>}, {pipeline_mode = #tpu.pipeline_mode<synchronous>, transform_indices = @transform_1, window_bounds = array<i64: 32, 64>}, {pipeline_mode = #tpu.pipeline_mode<synchronous>, transform_indices = @transform_2, window_bounds = array<i64: 1, 64>}, {pipeline_mode = #tpu.pipeline_mode<synchronous>, transform_indices = @transform_3, window_bounds = array<i64: 64, 64>}, {pipeline_mode = #tpu.pipeline_mode<synchronous>, transform_indices = @transform_4, window_bounds = array<i64: 1, 64>}, {pipeline_mode = #tpu.pipeline_mode<synchronous>, transform_indices = @transform_5, window_bounds = array<i64: 64, 32>}, {pipeline_mode = #tpu.pipeline_mode<synchronous>, transform_indices = @transform_6, window_bounds = array<i64: 1, 32>}, {transform_indices = @transform_7, window_bounds = array<i64: 128, 32>}]} {
    %c0 = arith.constant 0 : index
    %c0_0 = arith.constant 0 : index
    %0 = vector.load %arg1[%c0, %c0_0] : memref<128x32xf32, #tpu.memory_space<vmem>>, vector<128x32xf32>
    %c0_1 = arith.constant 0 : index
    %c0_2 = arith.constant 0 : index
    %1 = vector.load %arg2[%c0_1, %c0_2] : memref<32x64xf32, #tpu.memory_space<vmem>>, vector<32x64xf32>
    %cst = arith.constant dense<0.000000e+00> : vector<128x64xf32>
    %2 = tpu.matmul %0, %1, %cst {dimension_numbers = #tpu.dot_dimension_numbers<[1], [0], [0], [1], [0, 0, 1, 1], [], []>} : vector<128x32xf32>, vector<32x64xf32>, vector<128x64xf32> -> vector<128x64xf32>
    %c0_3 = arith.constant 0 : index
    %c0_4 = arith.constant 0 : index
    %3 = vector.load %arg3[%c0_3, %c0_4] : memref<1x64xf32, #tpu.memory_space<vmem>>, vector<1x64xf32>
    %4 = vector.broadcast %3 : vector<1x64xf32> to vector<128x64xf32>
    %5 = arith.addf %2, %4 : vector<128x64xf32>
    %cst_5 = arith.constant 0.00999999977 : f32
    %6 = vector.broadcast %cst_5 : f32 to vector<128x64xf32>
    %7 = arith.mulf %6, %5 : vector<128x64xf32>
    %8 = arith.maximumf %5, %7 : vector<128x64xf32>
    %c0_6 = arith.constant 0 : index
    %c0_7 = arith.constant 0 : index
    %9 = vector.load %arg4[%c0_6, %c0_7] : memref<64x64xf32, #tpu.memory_space<vmem>>, vector<64x64xf32>
    %cst_8 = arith.constant dense<0.000000e+00> : vector<128x64xf32>
    %10 = tpu.matmul %8, %9, %cst_8 {dimension_numbers = #tpu.dot_dimension_numbers<[1], [0], [0], [1], [0, 0, 1, 1], [], []>} : vector<128x64xf32>, vector<64x64xf32>, vector<128x64xf32> -> vector<128x64xf32>
    %c0_9 = arith.constant 0 : index
    %c0_10 = arith.constant 0 : index
    %11 = vector.load %arg5[%c0_9, %c0_10] : memref<1x64xf32, #tpu.memory_space<vmem>>, vector<1x64xf32>
    %12 = vector.broadcast %11 : vector<1x64xf32> to vector<128x64xf32>
    %13 = arith.addf %10, %12 : vector<128x64xf32>
    %cst_11 = arith.constant 0.00999999977 : f32
    %14 = vector.broadcast %cst_11 : f32 to vector<128x64xf32>
    %15 = arith.mulf %14, %13 : vector<128x64xf32>
    %16 = arith.maximumf %13, %15 : vector<128x64xf32>
    %c0_12 = arith.constant 0 : index
    %c0_13 = arith.constant 0 : index
    %17 = vector.load %arg6[%c0_12, %c0_13] : memref<64x32xf32, #tpu.memory_space<vmem>>, vector<64x32xf32>
    %cst_14 = arith.constant dense<0.000000e+00> : vector<128x32xf32>
    %18 = tpu.matmul %16, %17, %cst_14 {dimension_numbers = #tpu.dot_dimension_numbers<[1], [0], [0], [1], [0, 0, 1, 1], [], []>} : vector<128x64xf32>, vector<64x32xf32>, vector<128x32xf32> -> vector<128x32xf32>
    %c0_15 = arith.constant 0 : index
    %c0_16 = arith.constant 0 : index
    %19 = vector.load %arg7[%c0_15, %c0_16] : memref<1x32xf32, #tpu.memory_space<vmem>>, vector<1x32xf32>
    %20 = vector.broadcast %19 : vector<1x32xf32> to vector<128x32xf32>
    %21 = arith.addf %18, %20 : vector<128x32xf32>
    %cst_17 = arith.constant 0.00999999977 : f32
    %22 = vector.broadcast %cst_17 : f32 to vector<128x32xf32>
    %23 = arith.mulf %22, %21 : vector<128x32xf32>
    %24 = arith.maximumf %21, %23 : vector<128x32xf32>
    %c0_18 = arith.constant 0 : index
    %c0_19 = arith.constant 0 : index
    %25 = vector.load %arg8[%c0_18, %c0_19] : memref<128x32xf32, #tpu.memory_space<vmem>>, vector<128x32xf32>
    tpu.vector_store %arg8[%c0_18, %c0_19], %24 {strides = array<i32>} : memref<128x32xf32, #tpu.memory_space<vmem>>, vector<128x32xf32>,
    return
  }
  func.func @transform_0(%arg0: i32) -> (i32, i32) {
    %c0_i32 = arith.constant 0 : i32
    %c0_i32_0 = arith.constant 0 : i32
    return %arg0, %c0_i32 : i32, i32
  }
  func.func @transform_1(%arg0: i32) -> (i32, i32) {
    %c0_i32 = arith.constant 0 : i32
    %c0_i32_0 = arith.constant 0 : i32
    %c0_i32_1 = arith.constant 0 : i32
    return %c0_i32, %c0_i32_0 : i32, i32
  }
  func.func @transform_2(%arg0: i32) -> (i32, i32) {
    %c0_i32 = arith.constant 0 : i32
    %c0_i32_0 = arith.constant 0 : i32
    %c0_i32_1 = arith.constant 0 : i32
    return %c0_i32, %c0_i32_0 : i32, i32
  }
  func.func @transform_3(%arg0: i32) -> (i32, i32) {
    %c0_i32 = arith.constant 0 : i32
    %c0_i32_0 = arith.constant 0 : i32
    %c0_i32_1 = arith.constant 0 : i32
    return %c0_i32, %c0_i32_0 : i32, i32
  }
  func.func @transform_4(%arg0: i32) -> (i32, i32) {
    %c0_i32 = arith.constant 0 : i32
    %c0_i32_0 = arith.constant 0 : i32
    %c0_i32_1 = arith.constant 0 : i32
    return %c0_i32, %c0_i32_0 : i32, i32
  }
  func.func @transform_5(%arg0: i32) -> (i32, i32) {
    %c0_i32 = arith.constant 0 : i32
    %c0_i32_0 = arith.constant 0 : i32
    %c0_i32_1 = arith.constant 0 : i32
    return %c0_i32, %c0_i32_0 : i32, i32
  }
  func.func @transform_6(%arg0: i32) -> (i32, i32) {
    %c0_i32 = arith.constant 0 : i32
    %c0_i32_0 = arith.constant 0 : i32
    %c0_i32_1 = arith.constant 0 : i32
    return %c0_i32, %c0_i32_0 : i32, i32
  }
  func.func @transform_7(%arg0: i32) -> (i32, i32) {
    %c0_i32 = arith.constant 0 : i32
    %c0_i32_0 = arith.constant 0 : i32
    return %arg0, %c0_i32 : i32, i32
  }
}

</mosaic_0001>

<bundles_post_ra>
// kernel: forward.1
= control target key start
LH: loop header
LB: loop body
LE: loop exit
PB: predicated region body
PF: predicated region fallthrough
CT: control target
= control target key end

     0   :  { %s1394_s24 = smov 0   ;;  %s1641_s0 = inlined_call_operand.vmem [shape: f32[256,32], index: 0, kind: input, shape index: {}]   ;;  %s1642_s1 = inlined_call_operand.vmem [shape: f32[32,64], index: 1, kind: input, shape index: {}]   ;;  %s1643_s2 = inlined_call_operand.vmem [shape: f32[1,64], index: 2, kind: input, shape index: {}]   ;;  %s1644_s3 = inlined_call_operand.vmem [shape: f32[64,64], index: 3, kind: input, shape index: {}]   ;;  %s1645_s4 = inlined_call_operand.vmem [shape: f32[1,64], index: 4, kind: input, shape index: {}]   ;;  %s1646_s5 = inlined_call_operand.vmem [shape: f32[64,32], index: 5, kind: input, shape index: {}]   ;;  %s1647_s6 = inlined_call_operand.vmem [shape: f32[1,32], index: 6, kind: input, shape index: {}]   ;;  %s1648_s7 = inlined_call_operand.vmem [shape: f32[256,32], index: 7, kind: output, shape index: {}]  }
   0x1 LB: > { %s1088_s25 = sadd.s32 4294967295, %s1352_s24   ;;  %p1092_p0 = scmp.ge.s32.totalorder %s1352_s24, 1  ;;  %s1352_s24 = sphi %s1394_s24, %s17_s24  }
   0x2   : > { %p238_p1 = scmp.lt.s32.totalorder %s1352_s24, 3 }
   0x4   : > { %p239_p2 = pnand %p1092_p0, %p238_p1 }
   0x5   : > { %s1093_s30 = sshll.u32 (!%p239_p2), %s1088_s25, 4 }
   0x6   : > { %242 = sbr.rel (%p239_p2) target bundleno = 654 (0x28e), region = 48  ;;  %p271_p3 = scmp.lt.s32.totalorder (!%p239_p2), %s1093_s30, 31 }
   0xb   : > { %v301_v0 = vld [vmem:[%s1642_s1 + $0x18] sm:$0xff]  ;;  %v300_v1 = vld [vmem:[%s1642_s1 + $0x10] sm:$0xff]  ;;  %v299_v2 = vld [vmem:[%s1642_s1 + $0x8] sm:$0xff]  ;;  %s1650_s30 = smov (!%p271_p3, %s1093_s30), 31  ;;  %vm309_vm0 = vcmask 261120   ;;  %vm550_vm1 = vcmask 523264  }
   0xc   : > { %1218 = vmatprep.subr.mxu0 %v301_v0  ;;  %1330 = vmatprep.subr.mxu1 %v301_v0  ;;  %v298_v3 = vld [vmem:[%s1642_s1] sm:$0xff]  ;;  %s1094_s12 = sshll.u32 %s1650_s30, 3  ;;  %v542_v7 = vld [vmem:[%s1644_s3 + $0x38] sm:$0xff]  ;;  %v541_v9 = vld [vmem:[%s1644_s3 + $0x30] sm:$0xff] }
   0xd   : > { %1219 = vmatpush3.msra.mxu0 %v301_v0  ;;  %1334 = vmatpush3.msra.mxu1 %v301_v0  ;;  %s1422_s15 = scalar_lea.vmem %s1641_s0, %s1094_s12  ;;  %v540_v15 = vld [vmem:[%s1644_s3 + $0x28] sm:$0xff]  ;;  %v539_v18 = vld [vmem:[%s1644_s3 + $0x20] sm:$0xff]  ;;  %v538_v24 = vld [vmem:[%s1644_s3 + $0x18] sm:$0xff]  ;;  %s1590_s16 = scalar_lea.vmem %s1648_s7, %s1094_s12 }
   0xe   : > { %1220 = vmatprep.subr.mxu0 %v300_v1  ;;  %1331 = vmatprep.subr.mxu1 %v300_v1  ;;  %v282_v4 = vld [vmem:[%s1422_s15] sm:$0xff]  ;;  %v283_v5 = vld [vmem:[%s1422_s15 + $0x8] sm:$0xff]  ;;  %v284_v6 = vld [vmem:[%s1422_s15 + $0x10] sm:$0xff] }
   0xf   : > { %1221 = vmatpush3.msra.mxu0 %v300_v1  ;;  %1335 = vmatpush3.msra.mxu1 %v300_v1  ;;  %v290_v8 = vld [vmem:[%s1422_s15 + $0x40] sm:$0xff]  ;;  %v285_v10 = vld [vmem:[%s1422_s15 + $0x18] sm:$0xff]  ;;  %v291_v11 = vld [vmem:[%s1422_s15 + $0x48] sm:$0xff] }
  0x10   : > { %1222 = vmatprep.subr.mxu0 %v299_v2  ;;  %1332 = vmatprep.subr.mxu1 %v299_v2  ;;  %v292_v12 = vld [vmem:[%s1422_s15 + $0x50] sm:$0xff]  ;;  %v286_v13 = vld [vmem:[%s1422_s15 + $0x20] sm:$0xff]  ;;  %v293_v14 = vld [vmem:[%s1422_s15 + $0x58] sm:$0xff] }
  0x11   : > { %1223 = vmatpush3.msra.mxu0 %v299_v2  ;;  %1336 = vmatpush3.msra.mxu1 %v299_v2  ;;  %v294_v16 = vld [vmem:[%s1422_s15 + $0x60] sm:$0xff]  ;;  %v287_v17 = vld [vmem:[%s1422_s15 + $0x28] sm:$0xff]  ;;  %v288_v19 = vld [vmem:[%s1422_s15 + $0x30] sm:$0xff] }
  0x12   : > { %1224 = vmatprep.subr.mxu0 %v298_v3  ;;  %1333 = vmatprep.subr.mxu1 %v298_v3  ;;  %v295_v20 = vld [vmem:[%s1422_s15 + $0x68] sm:$0xff]  ;;  %v296_v21 = vld [vmem:[%s1422_s15 + $0x70] sm:$0xff]  ;;  %v289_v22 = vld [vmem:[%s1422_s15 + $0x38] sm:$0xff] }
  0x13   : > { %1225 = vmatpush3.msra.mxu0 %v298_v3  ;;  %1226 = vmatprep.mubr.msk.f32.mxu0 %vm309_vm0, %v282_v4  ;;  %v297_v23 = vld [vmem:[%s1422_s15 + $0x78] sm:$0xff]  ;;  %v537_v25 = vld [vmem:[%s1644_s3 + $0x10] sm:$0xff]  ;;  %v536_v26 = vld [vmem:[%s1644_s3 + $0x8] sm:$0xff] }
  0x14   : > { %1227 = vmatmul.mubr.msk.f32.vlgmr.msra.gmra.mxu0 %vm309_vm0, %v283_v5  ;;  %1337 = vmatpush3.msra.mxu1 %v298_v3  ;;  %v535_v27 = vld [vmem:[%s1644_s3] sm:$0xff]  ;;  %v783_v28 = vld [vmem:[%s1646_s5 + $0x38] sm:$0xff]  ;;  %v782_v29 = vld [vmem:[%s1646_s5 + $0x30] sm:$0xff] }
  0x15   : > { %1229 = vmatprep.mubr.msk.f32.mxu0 %vm309_vm0, %v284_v6  ;;  %1238 = vmatprep.mubr.msk.f32.mxu1 %vm309_vm0, %v290_v8  ;;  %v781_v30 = vld [vmem:[%s1646_s5 + $0x28] sm:$0xff]  ;;  %v780_v31 = vld [vmem:[%s1646_s5 + $0x20] sm:$0xff] }
  0x16   : > { %1239 = vmatmul.mubr.msk.f32.vlgmr.msra.gmra.mxu1 %vm309_vm0, %v291_v11  ;;  %1250 = vmatprep.subr.mxu1 %v542_v7  ;;  %v1495_v32 = vld [vmem:[%s1643_s2] ss:$0 sm:$0xff] }
  0x17   : > { %1241 = vmatprep.mubr.msk.f32.mxu1 %vm309_vm0, %v292_v12  ;;  %1251 = vmatpush3.msra.mxu1 %v542_v7 }
  0x18   : > { %1230 = vmatmul.mubr.msk.f32.gmra.mxu0 %vm309_vm0, %v285_v10  ;;  %1252 = vmatprep.subr.mxu1 %v541_v9 }
  0x19   : > { %1232 = vmatprep.mubr.msk.f32.mxu0 %vm309_vm0, %v286_v13  ;;  %1253 = vmatpush3.msra.mxu1 %v541_v9 }
  0x1a   : > { %1242 = vmatmul.mubr.msk.f32.gmra.mxu1 %vm309_vm0, %v293_v14  ;;  %1254 = vmatprep.subr.mxu1 %v540_v15 }
  0x1b   : > { %1244 = vmatprep.mubr.msk.f32.mxu1 %vm309_vm0, %v294_v16  ;;  %1255 = vmatpush3.msra.mxu1 %v540_v15 }
  0x1c   : > { %1233 = vmatmul.mubr.msk.f32.gmra.mxu0 %vm309_vm0, %v287_v17  ;;  %1256 = vmatprep.subr.mxu1 %v539_v18 }
  0x1d   : > { %1235 = vmatprep.mubr.msk.f32.mxu0 %vm309_vm0, %v288_v19  ;;  %1257 = vmatpush3.msra.mxu1 %v539_v18 }
  0x1e   : > { %1245 = vmatmul.mubr.msk.f32.gmra.mxu1 %vm309_vm0, %v295_v20  ;;  %1258 = vmatprep.subr.mxu1 %v538_v24 }
  0x1f   : > { %1247 = vmatprep.mubr.msk.f32.mxu1 %vm309_vm0, %v296_v21  ;;  %1259 = vmatpush3.msra.mxu1 %v538_v24 }
  0x20   : > { %1236 = vmatmul.mubr.msk.f32.gmra.mxu0 %vm309_vm0, %v289_v22  ;;  %1260 = vmatprep.subr.mxu1 %v537_v25 }
  0x21   : > { %1261 = vmatpush3.msra.mxu1 %v537_v25  ;;  %1290 = vmatprep.subr.mxu0 %v783_v28 }
  0x22   : > { %1248 = vmatmul.mubr.msk.f32.gmra.mxu1 %vm309_vm0, %v297_v23  ;;  %1262 = vmatprep.subr.mxu1 %v536_v26 }
  0x23   : > { %1263 = vmatpush3.msra.mxu1 %v536_v26  ;;  %1291 = vmatpush3.msra.mxu0 %v783_v28 }
  0x24   : > { %1264 = vmatprep.subr.mxu1 %v535_v27  ;;  %1292 = vmatprep.subr.mxu0 %v782_v29 }
  0x25   : > { %1265 = vmatpush3.msra.mxu1 %v535_v27  ;;  %1293 = vmatpush3.msra.mxu0 %v782_v29 }
  0x26   : > { %1294 = vmatprep.subr.mxu0 %v781_v30 }
  0x27   : > { %1295 = vmatpush3.msra.mxu0 %v781_v30 }
  0x28   : > { %1296 = vmatprep.subr.mxu0 %v780_v31 }
  0x29   : > { %1297 = vmatpush3.msra.mxu0 %v780_v31 }
  0xd4   : > { %v1228_v33 = vpop.f32.mrf.mxu0 }
  0xd5   : > { %v430_v34 = vadd.f32 %v1228_v33, %v1495_v32 }
  0xd6   : > { %v424_v35 = vpop.f32.mrf.mxu0  ;;  %v1240_v36 = vpop.f32.mrf.mxu1 }
  0xd7   : > { %v425_v37 = vadd.f32 %v1495_v32, %v424_v35  ;;  %v504_v38 = vmul.f32 0.01, %v430_v34  ;;  %v470_v5 = vadd.f32 %v1240_v36, %v1495_v32  ;;  %v777_v35 = vld [vmem:[%s1646_s5 + $0x8] sm:$0xff]  ;;  %v776_v36 = vld [vmem:[%s1646_s5] sm:$0xff] }
  0xd8   : > { %v1231_v39 = vpop.f32.mrf.mxu0  ;;  %v464_v40 = vpop.f32.mrf.mxu1 }
  0xd9   : > { %v503_v41 = vmul.f32 0.01, %v425_v37  ;;  %v440_v42 = vadd.f32 %v1231_v39, %v1495_v32  ;;  %v520_v47 = vmax.f32 %v430_v34, %v504_v38  ;;  %v465_v62 = vadd.f32 %v1495_v32, %v464_v40  ;;  %v778_v34 = vld [vmem:[%s1646_s5 + $0x10] sm:$0xff] }
  0xda   : > { %v434_v43 = vpop.f32.mrf.mxu0  ;;  %v1243_v44 = vpop.f32.mrf.mxu1  ;;  %v512_v12 = vmul.f32 0.01, %v470_v5 }
  0xdb   : > { %v519_v45 = vmax.f32 %v425_v37, %v503_v41  ;;  %v435_v46 = vadd.f32 %v1495_v32, %v434_v43  ;;  %v506_v48 = vmul.f32 0.01, %v440_v42  ;;  %v511_v7 = vmul.f32 0.01, %v465_v62  ;;  %v1544_v37 = vld [vmem:[%s1645_s4] ss:$0 sm:$0xff] }
  0xdc   : > { %v1234_v49 = vpop.f32.mrf.mxu0  ;;  %v474_v50 = vpop.f32.mrf.mxu1  ;;  %v480_v13 = vadd.f32 %v1243_v44, %v1495_v32  ;;  %v528_v18 = vmax.f32 %v470_v5, %v512_v12 }
  0xdd   : > { %v505_v51 = vmul.f32 0.01, %v435_v46  ;;  %v450_v52 = vadd.f32 %v1234_v49, %v1495_v32  ;;  %1266 = vmatprep.mubr.msk.f32.mxu1 %vm550_vm1, %v519_v45  ;;  %v522_v57 = vmax.f32 %v440_v42, %v506_v48  ;;  %v475_v8 = vadd.f32 %v1495_v32, %v474_v50 }
  0xde   : > { %v444_v53 = vpop.f32.mrf.mxu0  ;;  %1267 = vmatmul.mubr.msk.f32.vlgmr.msra.gmra.mxu1 %vm550_vm1, %v520_v47  ;;  %v1246_v54 = vpop.f32.mrf.mxu1  ;;  %v527_v14 = vmax.f32 %v465_v62, %v511_v7  ;;  %v514_v19 = vmul.f32 0.01, %v480_v13 }
  0xdf   : > { %v521_v55 = vmax.f32 %v435_v46, %v505_v51  ;;  %v445_v56 = vadd.f32 %v1495_v32, %v444_v53  ;;  %v508_v58 = vmul.f32 0.01, %v450_v52  ;;  %v513_v15 = vmul.f32 0.01, %v475_v8 }
  0xe0   : > { %v1237_v59 = vpop.f32.mrf.mxu0  ;;  %v484_v0 = vpop.f32.mrf.mxu1  ;;  %v490_v20 = vadd.f32 %v1246_v54, %v1495_v32  ;;  %v530_v24 = vmax.f32 %v480_v13, %v514_v19 }
  0xe1   : > { %v507_v60 = vmul.f32 0.01, %v445_v56  ;;  %v460_v61 = vadd.f32 %v1237_v59, %v1495_v32  ;;  %1269 = vmatprep.mubr.msk.f32.mxu1 %vm550_vm1, %v521_v55  ;;  %v524_v3 = vmax.f32 %v450_v52, %v508_v58  ;;  %v485_v16 = vadd.f32 %v1495_v32, %v484_v0 }
  0xe2   : > { %v454_v63 = vpop.f32.mrf.mxu0  ;;  %1270 = vmatmul.mubr.msk.f32.gmra.mxu1 %vm550_vm1, %v522_v57  ;;  %v1249_v9 = vpop.f32.mrf.mxu1  ;;  %v529_v21 = vmax.f32 %v475_v8, %v513_v15  ;;  %v516_v25 = vmul.f32 0.01, %v490_v20 }
  0xe3   : > { %v523_v1 = vmax.f32 %v445_v56, %v507_v60  ;;  %v455_v2 = vadd.f32 %v1495_v32, %v454_v63  ;;  %v510_v4 = vmul.f32 0.01, %v460_v61  ;;  %v515_v22 = vmul.f32 0.01, %v485_v16 }
  0xe4   : > { %v494_v17 = vpop.f32.mrf.mxu1  ;;  %v500_v26 = vadd.f32 %v1249_v9, %v1495_v32  ;;  %v532_v29 = vmax.f32 %v490_v20, %v516_v25 }
  0xe5   : > { %v509_v6 = vmul.f32 0.01, %v455_v2  ;;  %1272 = vmatprep.mubr.msk.f32.mxu1 %vm550_vm1, %v523_v1  ;;  %v526_v11 = vmax.f32 %v460_v61, %v510_v4  ;;  %v495_v23 = vadd.f32 %v1495_v32, %v494_v17  ;;  %v531_v27 = vmax.f32 %v485_v16, %v515_v22  ;;  %v779_v32 = vld [vmem:[%s1646_s5 + $0x18] sm:$0xff] }
  0xe6   : > { %1273 = vmatmul.mubr.msk.f32.gmra.mxu1 %vm550_vm1, %v524_v3  ;;  %v518_v30 = vmul.f32 0.01, %v500_v26  ;;  %1298 = vmatprep.subr.mxu0 %v779_v32 }
  0xe7   : > { %v525_v10 = vmax.f32 %v455_v2, %v509_v6  ;;  %v517_v28 = vmul.f32 0.01, %v495_v23  ;;  %1299 = vmatpush3.msra.mxu0 %v779_v32 }
  0xe8   : > { %v534_v33 = vmax.f32 %v500_v26, %v518_v30  ;;  %1300 = vmatprep.subr.mxu0 %v778_v34 }
  0xe9   : > { %1275 = vmatprep.mubr.msk.f32.mxu1 %vm550_vm1, %v525_v10  ;;  %v533_v31 = vmax.f32 %v495_v23, %v517_v28  ;;  %1301 = vmatpush3.msra.mxu0 %v778_v34 }
  0xea   : > { %1276 = vmatmul.mubr.msk.f32.gmra.mxu1 %vm550_vm1, %v526_v11  ;;  %1302 = vmatprep.subr.mxu0 %v777_v35 }
  0xeb   : > { %1278 = vmatprep.mubr.msk.f32.mxu1 %vm550_vm1, %v527_v14  ;;  %1303 = vmatpush3.msra.mxu0 %v777_v35 }
  0xec   : > { %1304 = vmatprep.subr.mxu0 %v776_v36 }
  0xed   : > { %1305 = vmatpush3.msra.mxu0 %v776_v36 }
  0xee   : > { %1279 = vmatmul.mubr.msk.f32.gmra.mxu1 %vm550_vm1, %v528_v18 }
  0xef   : > { %1281 = vmatprep.mubr.msk.f32.mxu1 %vm550_vm1, %v529_v21 }
  0xf2   : > { %1282 = vmatmul.mubr.msk.f32.gmra.mxu1 %vm550_vm1, %v530_v24 }
  0xf3   : > { %1284 = vmatprep.mubr.msk.f32.mxu1 %vm550_vm1, %v531_v27 }
  0xf6   : > { %1285 = vmatmul.mubr.msk.f32.gmra.mxu1 %vm550_vm1, %v532_v29 }
  0xf7   : > { %1287 = vmatprep.mubr.msk.f32.mxu1 %vm550_vm1, %v533_v31 }
  0xfa   : > { %1288 = vmatmul.mubr.msk.f32.gmra.mxu1 %vm550_vm1, %v534_v33 }
 0x19e   : > { %v1268_v38 = vpop.f32.mrf.mxu1 }
 0x19f   : > { %v671_v39 = vadd.f32 %v1268_v38, %v1544_v37 }
 0x1a0   : > { %v665_v40 = vpop.f32.mrf.mxu1 }
 0x1a1   : > { %v666_v41 = vadd.f32 %v1544_v37, %v665_v40  ;;  %v745_v42 = vmul.f32 0.01, %v671_v39 }
 0x1a2   : > { %v1271_v43 = vpop.f32.mrf.mxu1 }
 0x1a3   : > { %v744_v44 = vmul.f32 0.01, %v666_v41  ;;  %v681_v45 = vadd.f32 %v1271_v43, %v1544_v37  ;;  %v761_v49 = vmax.f32 %v671_v39, %v745_v42  ;;  %v1581_v39 = vld [vmem:[%s1647_s6] ss:$0 sm:$0xff] }
 0x1a4   : > { %v675_v46 = vpop.f32.mrf.mxu1 }
 0x1a5   : > { %v760_v47 = vmax.f32 %v666_v41, %v744_v44  ;;  %v676_v48 = vadd.f32 %v1544_v37, %v675_v46  ;;  %v747_v50 = vmul.f32 0.01, %v681_v45 }
 0x1a6   : > { %v1274_v51 = vpop.f32.mrf.mxu1 }
 0x1a7   : > { %v746_v52 = vmul.f32 0.01, %v676_v48  ;;  %v691_v53 = vadd.f32 %v1274_v51, %v1544_v37  ;;  %1306 = vmatprep.mubr.msk.f32.mxu0 %vm550_vm1, %v760_v47  ;;  %v763_v57 = vmax.f32 %v681_v45, %v747_v50 }
 0x1a8   : > { %v685_v54 = vpop.f32.mrf.mxu1  ;;  %1307 = vmatmul.mubr.msk.f32.vlgmr.msra.gmra.mxu0 %vm550_vm1, %v761_v49 }
 0x1a9   : > { %v762_v55 = vmax.f32 %v676_v48, %v746_v52  ;;  %v686_v56 = vadd.f32 %v1544_v37, %v685_v54  ;;  %v749_v58 = vmul.f32 0.01, %v691_v53 }
 0x1aa   : > { %v1277_v59 = vpop.f32.mrf.mxu1 }
 0x1ab   : > { %v748_v60 = vmul.f32 0.01, %v686_v56  ;;  %v701_v61 = vadd.f32 %v1277_v59, %v1544_v37  ;;  %1309 = vmatprep.mubr.msk.f32.mxu0 %vm550_vm1, %v762_v55  ;;  %v765_v1 = vmax.f32 %v691_v53, %v749_v58 }
 0x1ac   : > { %v695_v62 = vpop.f32.mrf.mxu1  ;;  %1310 = vmatmul.mubr.msk.f32.gmra.mxu0 %vm550_vm1, %v763_v57 }
 0x1ad   : > { %v764_v63 = vmax.f32 %v686_v56, %v748_v60  ;;  %v696_v0 = vadd.f32 %v1544_v37, %v695_v62  ;;  %v751_v2 = vmul.f32 0.01, %v701_v61 }
 0x1ae   : > { %v1280_v3 = vpop.f32.mrf.mxu1 }
 0x1af   : > { %v750_v4 = vmul.f32 0.01, %v696_v0  ;;  %v711_v5 = vadd.f32 %v1280_v3, %v1544_v37  ;;  %1312 = vmatprep.mubr.msk.f32.mxu0 %vm550_vm1, %v764_v63  ;;  %v767_v9 = vmax.f32 %v701_v61, %v751_v2 }
 0x1b0   : > { %v705_v6 = vpop.f32.mrf.mxu1  ;;  %1313 = vmatmul.mubr.msk.f32.gmra.mxu0 %vm550_vm1, %v765_v1 }
 0x1b1   : > { %v766_v7 = vmax.f32 %v696_v0, %v750_v4  ;;  %v706_v8 = vadd.f32 %v1544_v37, %v705_v6  ;;  %v753_v10 = vmul.f32 0.01, %v711_v5 }
 0x1b2   : > { %v1283_v11 = vpop.f32.mrf.mxu1 }
 0x1b3   : > { %v752_v12 = vmul.f32 0.01, %v706_v8  ;;  %v721_v13 = vadd.f32 %v1283_v11, %v1544_v37  ;;  %1315 = vmatprep.mubr.msk.f32.mxu0 %vm550_vm1, %v766_v7  ;;  %v769_v17 = vmax.f32 %v711_v5, %v753_v10 }
 0x1b4   : > { %v715_v14 = vpop.f32.mrf.mxu1  ;;  %1316 = vmatmul.mubr.msk.f32.gmra.mxu0 %vm550_vm1, %v767_v9 }
 0x1b5   : > { %v768_v15 = vmax.f32 %v706_v8, %v752_v12  ;;  %v716_v16 = vadd.f32 %v1544_v37, %v715_v14  ;;  %v755_v18 = vmul.f32 0.01, %v721_v13 }
 0x1b6   : > { %v1286_v19 = vpop.f32.mrf.mxu1 }
 0x1b7   : > { %v754_v20 = vmul.f32 0.01, %v716_v16  ;;  %v731_v21 = vadd.f32 %v1286_v19, %v1544_v37  ;;  %1318 = vmatprep.mubr.msk.f32.mxu0 %vm550_vm1, %v768_v15  ;;  %v771_v25 = vmax.f32 %v721_v13, %v755_v18 }
 0x1b8   : > { %v725_v22 = vpop.f32.mrf.mxu1  ;;  %1319 = vmatmul.mubr.msk.f32.gmra.mxu0 %vm550_vm1, %v769_v17 }
 0x1b9   : > { %v770_v23 = vmax.f32 %v716_v16, %v754_v20  ;;  %v726_v24 = vadd.f32 %v1544_v37, %v725_v22  ;;  %v757_v26 = vmul.f32 0.01, %v731_v21 }
 0x1ba   : > { %v1289_v27 = vpop.f32.mrf.mxu1 }
 0x1bb   : > { %v756_v28 = vmul.f32 0.01, %v726_v24  ;;  %v741_v29 = vadd.f32 %v1289_v27, %v1544_v37  ;;  %1321 = vmatprep.mubr.msk.f32.mxu0 %vm550_vm1, %v770_v23  ;;  %v773_v32 = vmax.f32 %v731_v21, %v757_v26 }
 0x1bc   : > { %v735_v30 = vpop.f32.mrf.mxu1  ;;  %1322 = vmatmul.mubr.msk.f32.gmra.mxu0 %vm550_vm1, %v771_v25 }
 0x1bd   : > { %v772_v31 = vmax.f32 %v726_v24, %v756_v28  ;;  %v736_v33 = vadd.f32 %v1544_v37, %v735_v30  ;;  %v759_v34 = vmul.f32 0.01, %v741_v29 }
 0x1bf   : > { %v758_v35 = vmul.f32 0.01, %v736_v33  ;;  %1324 = vmatprep.mubr.msk.f32.mxu0 %vm550_vm1, %v772_v31  ;;  %v775_v38 = vmax.f32 %v741_v29, %v759_v34 }
 0x1c0   : > { %1325 = vmatmul.mubr.msk.f32.gmra.mxu0 %vm550_vm1, %v773_v32 }
 0x1c1   : > { %v774_v36 = vmax.f32 %v736_v33, %v758_v35 }
 0x1c3   : > { %1327 = vmatprep.mubr.msk.f32.mxu0 %vm550_vm1, %v774_v36 }
 0x1c4   : > { %1328 = vmatmul.mubr.msk.f32.gmra.mxu0 %vm550_vm1, %v775_v38 }
 0x268   : > { %v1308_v37 = vpop.f32.mrf.mxu0 }
 0x269   : > { %v911_v40 = vadd.f32 %v1308_v37, %v1581_v39 }
 0x26a   : > { %v905_v41 = vpop.f32.mrf.mxu0 }
 0x26b   : > { %v985_v42 = vmul.f32 0.01, %v911_v40  ;;  %v906_v43 = vadd.f32 %v1581_v39, %v905_v41 }
 0x26c   : > { %v1311_v44 = vpop.f32.mrf.mxu0 }
 0x26d   : > { %v1001_v45 = vmax.f32 %v911_v40, %v985_v42  ;;  %v984_v46 = vmul.f32 0.01, %v906_v43  ;;  %v921_v47 = vadd.f32 %v1311_v44, %v1581_v39 }
 0x26e   : > { %v915_v48 = vpop.f32.mrf.mxu0 }
 0x26f   : > { %1017 = vst.msk [vmem:[%s1590_s16 + $0x8] sm:$0xff] %vm309_vm0, %v1001_v45  ;;  %v1000_v49 = vmax.f32 %v906_v43, %v984_v46  ;;  %v987_v50 = vmul.f32 0.01, %v921_v47  ;;  %v916_v51 = vadd.f32 %v1581_v39, %v915_v48 }
 0x270   : > { %v1314_v52 = vpop.f32.mrf.mxu0 }
 0x271   : > { %1016 = vst.msk [vmem:[%s1590_s16] sm:$0xff] %vm309_vm0, %v1000_v49  ;;  %v1003_v53 = vmax.f32 %v921_v47, %v987_v50  ;;  %v986_v54 = vmul.f32 0.01, %v916_v51  ;;  %v931_v55 = vadd.f32 %v1314_v52, %v1581_v39 }
 0x272   : > { %v925_v56 = vpop.f32.mrf.mxu0 }
 0x273   : > { %1019 = vst.msk [vmem:[%s1590_s16 + $0x18] sm:$0xff] %vm309_vm0, %v1003_v53  ;;  %v1002_v57 = vmax.f32 %v916_v51, %v986_v54  ;;  %v989_v58 = vmul.f32 0.01, %v931_v55  ;;  %v926_v59 = vadd.f32 %v1581_v39, %v925_v56 }
 0x274   : > { %v1317_v60 = vpop.f32.mrf.mxu0 }
 0x275   : > { %1018 = vst.msk [vmem:[%s1590_s16 + $0x10] sm:$0xff] %vm309_vm0, %v1002_v57  ;;  %v1005_v61 = vmax.f32 %v931_v55, %v989_v58  ;;  %v988_v62 = vmul.f32 0.01, %v926_v59  ;;  %v941_v63 = vadd.f32 %v1317_v60, %v1581_v39 }
 0x276   : > { %v935_v0 = vpop.f32.mrf.mxu0 }
 0x277   : > { %1021 = vst.msk [vmem:[%s1590_s16 + $0x28] sm:$0xff] %vm309_vm0, %v1005_v61  ;;  %v1004_v1 = vmax.f32 %v926_v59, %v988_v62  ;;  %v991_v2 = vmul.f32 0.01, %v941_v63  ;;  %v936_v3 = vadd.f32 %v1581_v39, %v935_v0 }
 0x278   : > { %v1320_v4 = vpop.f32.mrf.mxu0 }
 0x279   : > { %1020 = vst.msk [vmem:[%s1590_s16 + $0x20] sm:$0xff] %vm309_vm0, %v1004_v1  ;;  %v1007_v5 = vmax.f32 %v941_v63, %v991_v2  ;;  %v990_v6 = vmul.f32 0.01, %v936_v3  ;;  %v951_v7 = vadd.f32 %v1320_v4, %v1581_v39 }
 0x27a   : > { %v945_v8 = vpop.f32.mrf.mxu0 }
 0x27b   : > { %1023 = vst.msk [vmem:[%s1590_s16 + $0x38] sm:$0xff] %vm309_vm0, %v1007_v5  ;;  %v1006_v9 = vmax.f32 %v936_v3, %v990_v6  ;;  %v993_v10 = vmul.f32 0.01, %v951_v7  ;;  %v946_v11 = vadd.f32 %v1581_v39, %v945_v8 }
 0x27c   : > { %v1323_v12 = vpop.f32.mrf.mxu0 }
 0x27d   : > { %1022 = vst.msk [vmem:[%s1590_s16 + $0x30] sm:$0xff] %vm309_vm0, %v1006_v9  ;;  %v1009_v13 = vmax.f32 %v951_v7, %v993_v10  ;;  %v992_v14 = vmul.f32 0.01, %v946_v11  ;;  %v961_v15 = vadd.f32 %v1323_v12, %v1581_v39 }
 0x27e   : > { %v955_v16 = vpop.f32.mrf.mxu0 }
 0x27f   : > { %1025 = vst.msk [vmem:[%s1590_s16 + $0x48] sm:$0xff] %vm309_vm0, %v1009_v13  ;;  %v1008_v17 = vmax.f32 %v946_v11, %v992_v14  ;;  %v995_v18 = vmul.f32 0.01, %v961_v15  ;;  %v956_v19 = vadd.f32 %v1581_v39, %v955_v16 }
 0x280   : > { %v1326_v20 = vpop.f32.mrf.mxu0 }
 0x281   : > { %1024 = vst.msk [vmem:[%s1590_s16 + $0x40] sm:$0xff] %vm309_vm0, %v1008_v17  ;;  %v1011_v21 = vmax.f32 %v961_v15, %v995_v18  ;;  %v994_v22 = vmul.f32 0.01, %v956_v19  ;;  %v971_v23 = vadd.f32 %v1326_v20, %v1581_v39 }
 0x282   : > { %v965_v24 = vpop.f32.mrf.mxu0 }
 0x283   : > { %1027 = vst.msk [vmem:[%s1590_s16 + $0x58] sm:$0xff] %vm309_vm0, %v1011_v21  ;;  %v1010_v25 = vmax.f32 %v956_v19, %v994_v22  ;;  %v997_v26 = vmul.f32 0.01, %v971_v23  ;;  %v966_v27 = vadd.f32 %v1581_v39, %v965_v24 }
 0x284   : > { %v1329_v28 = vpop.f32.mrf.mxu0 }
 0x285   : > { %1026 = vst.msk [vmem:[%s1590_s16 + $0x50] sm:$0xff] %vm309_vm0, %v1010_v25  ;;  %v1013_v29 = vmax.f32 %v971_v23, %v997_v26  ;;  %v996_v30 = vmul.f32 0.01, %v966_v27  ;;  %v981_v31 = vadd.f32 %v1329_v28, %v1581_v39 }
 0x286   : > { %v975_v33 = vpop.f32.mrf.mxu0 }
 0x287   : > { %1029 = vst.msk [vmem:[%s1590_s16 + $0x68] sm:$0xff] %vm309_vm0, %v1013_v29  ;;  %v1012_v32 = vmax.f32 %v966_v27, %v996_v30  ;;  %v999_v34 = vmul.f32 0.01, %v981_v31  ;;  %v976_v35 = vadd.f32 %v1581_v39, %v975_v33 }
 0x289   : > { %1028 = vst.msk [vmem:[%s1590_s16 + $0x60] sm:$0xff] %vm309_vm0, %v1012_v32  ;;  %v1015_v36 = vmax.f32 %v981_v31, %v999_v34  ;;  %v998_v38 = vmul.f32 0.01, %v976_v35 }
 0x28b   : > { %1031 = vst.msk [vmem:[%s1590_s16 + $0x78] sm:$0xff] %vm309_vm0, %v1015_v36  ;;  %v1014_v37 = vmax.f32 %v976_v35, %v998_v38 }
 0x28d   : > { %1030 = vst.msk [vmem:[%s1590_s16 + $0x70] sm:$0xff] %vm309_vm0, %v1014_v37 }
 0x28e PF: > { %s17_s24 = sadd.s32 1, %s1352_s24  }
 0x28f   : > { %p14_p4 = scmp.ge.s32.totalorder %s17_s24, 4  }
 0x291   :  { %16 = sbr.rel (!%p14_p4) target bundleno = 1 (0x1), region = 78 }

</bundles_post_ra>
